<compile_context>
chip_gen: v5e
topology: v5e:2x2
jax: 0.10.0
libtpu: 0.0.40
codegen_flags: <defaults>
</compile_context>

<pallas_src>
import jax
import jax.numpy as jnp
from jax.experimental import pallas as pl
from jax.experimental.pallas import tpu as pltpu

EPS = 1e-6   # matches nn.LayerNorm(channels, eps=1e-06)
LANE = 128


def _round_up(a, b):
    return ((a + b - 1) // b) * b


def _sublane(dtype):
    # dtype-native sublane tile: 8 rows for 4-byte, 16 for 2-byte, 32 for 1-byte.
    return max(8, 32 // jnp.dtype(dtype).itemsize)


def _vmem_capacity_bytes():
    try:
        return int(pltpu.get_tpu_info().vmem_capacity_bytes)
    except Exception:
        return 64 * 1024 * 1024   # conservative default (v7x per-TC VMEM)


def _silu(t, approx):
    if approx:
        # exp and approx reciprocal both land on the EUP slot (VALU stays free).
        return t * pl.reciprocal(1.0 + jnp.exp(-t), approx=True)
    return t * (1.0 / (1.0 + jnp.exp(-t)))


def _layernorm(x, gamma, beta, true_c, c_pad):
    """Two-pass LayerNorm over the TRUE channel count (padded lanes masked)."""
    inv_c = 1.0 / float(true_c)
    mean = jnp.sum(x, axis=-1, keepdims=True) * inv_c
    centered = x - mean
    if c_pad != true_c:
        lane = jax.lax.broadcasted_iota(jnp.int32, x.shape, dimension=x.ndim - 1)
        centered = jnp.where(lane < true_c, centered, 0.0)
    var = jnp.sum(centered * centered, axis=-1, keepdims=True) * inv_c
    # gamma/beta are zero-padded, so padded lanes of h stay exactly zero.
    return centered * jax.lax.rsqrt(var + EPS) * gamma + beta


# ----------------------------------------------------------------------------
# Kernels
# ----------------------------------------------------------------------------

def _make_resident_kernel(true_c, c_pad, mat_dtype, approx_silu):
    """Both (C_pad, C_pad) weights fully resident in VMEM."""

    def kernel(x_ref, params_ref, w1_ref, w2_ref, o_ref):
        x = x_ref[...].astype(jnp.float32)
        gamma = params_ref[0:1, :]
        beta = params_ref[1:2, :]
        b1 = params_ref[2:3, :]
        b2 = params_ref[3:4, :]

        h = _layernorm(x, gamma, beta, true_c, c_pad).astype(mat_dtype)
        t = jnp.dot(h, w1_ref[...], preferred_element_type=jnp.float32) + b1
        t = _silu(t, approx_silu).astype(mat_dtype)
        u = jnp.dot(t, w2_ref[...], preferred_element_type=jnp.float32) + b2
        # Residual: re-read the tile so the f32 copy of x is not live across the
        # two matmuls (frees tm*C_pad*4 bytes of live scratch).
        o_ref[...] = (x_ref[...].astype(jnp.float32) + u).astype(o_ref.dtype)

    return kernel


def _make_tiled_kernel(true_c, c_pad, mat_dtype, approx_silu):
    """Hidden/intermediate channel dim tiled over an inner 'arbitrary' grid axis."""

    def kernel(x_ref, params_ref, b1_ref, w1_ref, w2_ref, o_ref, h_sc, acc_sc):
        k = pl.program_id(1)

        @pl.when(k == 0)
        def _():
            x = x_ref[...].astype(jnp.float32)
            gamma = params_ref[0:1, :]
            beta = params_ref[1:2, :]
            h_sc[...] = _layernorm(x, gamma, beta, true_c, c_pad).astype(h_sc.dtype)
            acc_sc[...] = jnp.zeros_like(acc_sc)

        # t_k = SiLU(h @ w1[:, k] + b1[k]);  acc += t_k @ w2[k, :]
        t = jnp.dot(h_sc[...], w1_ref[...],
                    preferred_element_type=jnp.float32) + b1_ref[...]
        t = _silu(t, approx_silu).astype(mat_dtype)
        acc_sc[...] += jnp.dot(t, w2_ref[...], preferred_element_type=jnp.float32)

        @pl.when(k == pl.num_programs(1) - 1)
        def _():
            b2 = params_ref[3:4, :]
            u = acc_sc[...] + b2
            o_ref[...] = (x_ref[...].astype(jnp.float32) + u).astype(o_ref.dtype)

    return kernel


# ----------------------------------------------------------------------------
# VMEM models & planning
# ----------------------------------------------------------------------------

def _vmem_resident(tm, c_pad, x_bytes, w_bytes, w_buf):
    io = 2 * 2 * tm * c_pad * x_bytes               # x + out, double buffered
    weights = w_buf * 2 * c_pad * c_pad * w_bytes   # w1 + w2 (w_buf buffers each)
    params = 2 * 8 * c_pad * 4
    live = 3 * tm * c_pad * 4                       # f32 intermediates (h, t, u)
    return int(1.2 * (io + weights + params + live))


def _vmem_tiled(tm, c_pad, tk, x_bytes, w_bytes):
    io = 2 * 2 * tm * c_pad * x_bytes               # x + out
    weights = 2 * 2 * c_pad * tk * w_bytes          # w1 slab + w2 slab, double buffered
    params = 2 * 8 * c_pad * 4 + 2 * 8 * tk * 4
    scratch = tm * c_pad * (w_bytes + 4)            # h scratch + f32 accumulator
    live = 2 * tm * tk * 4                          # t tile temporaries
    return int(1.2 * (io + weights + params + scratch + live))


def _plan(M, c_pad, x_dtype, mat_dtype, tm_request, tk_request,
          force_weight_tiling, weight_buf_factor):
    x_bytes = jnp.dtype(x_dtype).itemsize
    w_bytes = jnp.dtype(mat_dtype).itemsize
    s = _sublane(x_dtype)

    capacity = _vmem_capacity_bytes()
    vmem_limit = min(int(0.75 * capacity), capacity - (8 << 20))
    budget = int(0.85 * vmem_limit)

    # Tiled-weights path if both full (C,C) weights would eat too much VMEM.
    resident_weight_bytes = weight_buf_factor * 2 * c_pad * c_pad * w_bytes
    use_tiled = force_weight_tiling or resident_weight_bytes > budget // 2

    tk = None
    if use_tiled:
        if tk_request is not None and c_pad % tk_request == 0:
            tk = tk_request
        else:
            for cand in (1024, 512, 256, 128):
                if c_pad % cand == 0 and 4 * c_pad * cand * w_bytes <= int(0.35 * budget):
                    tk = cand
                    break
            if tk is None:
                tk = 128

    # Row tile: target a ~4 MiB input slab (grows for small C), clipped to the row
    # count, a grid-step floor for megacore sharding, and the VMEM budget.
    if tm_request is None:
        tm = (4 << 20) // max(1, c_pad * x_bytes)
    else:
        tm = int(tm_request)
    tm = max(s, min(tm, 4096))
    tm = min(tm, _round_up(M, s))
    tm = _round_up(tm, s)

    # Keep >= 4 row grid steps when M is large enough, so the "parallel" axis can
    # shard across v7x's 2 TensorCores (negligible overhead on single-TC chips).
    step_cap = _round_up(-(-M // 4), s)
    if step_cap >= 128:
        tm = min(tm, step_cap)

    def fits(tm_):
        if use_tiled:
            return _vmem_tiled(tm_, c_pad, tk, x_bytes, w_bytes) <= budget
        return _vmem_resident(tm_, c_pad, x_bytes, w_bytes, weight_buf_factor) <= budget

    while not fits(tm) and tm > s:
        tm = max(s, _round_up(tm // 2, s))

    return dict(tm=tm, tk=tk, use_tiled=use_tiled, vmem_limit=int(vmem_limit))


# ----------------------------------------------------------------------------
# pallas_call builders
# ----------------------------------------------------------------------------

def _build_resident_call(kernel, m_pad, c_pad, tm, x_dtype, mat_dtype,
                         vmem_limit, single_buffer_weights):
    row_map = lambda i: (i, 0)
    const_map = lambda i: (0, 0)

    if single_buffer_weights:
        # Grid-invariant weights: single-buffer to halve their VMEM footprint.
        w_spec = pl.BlockSpec((c_pad, c_pad), const_map, pipeline_mode=pl.Buffered(1))
    else:
        w_spec = pl.BlockSpec((c_pad, c_pad), const_map)

    x_bytes = jnp.dtype(x_dtype).itemsize
    w_bytes = jnp.dtype(mat_dtype).itemsize
    cost = pl.CostEstimate(
        flops=int(4 * m_pad * c_pad * c_pad + 12 * m_pad * c_pad),
        transcendentals=int(m_pad * c_pad),
        bytes_accessed=int(2 * m_pad * c_pad * x_bytes
                           + 2 * c_pad * c_pad * w_bytes + 16 * c_pad),
    )

    return pl.pallas_call(
        kernel,
        out_shape=jax.ShapeDtypeStruct((m_pad, c_pad), x_dtype),
        grid_spec=pltpu.PrefetchScalarGridSpec(
            num_scalar_prefetch=0,
            grid=(m_pad // tm,),
            in_specs=[
                pl.BlockSpec((tm, c_pad), row_map),    # x row tile
                pl.BlockSpec((4, c_pad), const_map),   # packed gamma/beta/b1/b2
                w_spec,                                # w1 (in, out)
                w_spec,                                # w2 (in, out)
            ],
            out_specs=pl.BlockSpec((tm, c_pad), row_map),
        ),
        compiler_params=pltpu.CompilerParams(
            dimension_semantics=("parallel",),
            vmem_limit_bytes=vmem_limit,
        ),
        cost_estimate=cost,
    )


def _build_tiled_call(kernel, m_pad, c_pad, tm, tk, x_dtype, mat_dtype, vmem_limit):
    nk = c_pad // tk
    x_map = lambda i, k: (i, 0)
    const_map = lambda i, k: (0, 0)

    x_bytes = jnp.dtype(x_dtype).itemsize
    w_bytes = jnp.dtype(mat_dtype).itemsize
    n_row_steps = m_pad // tm
    cost = pl.CostEstimate(
        flops=int(4 * m_pad * c_pad * c_pad + 12 * m_pad * c_pad),
        transcendentals=int(m_pad * c_pad),
        bytes_accessed=int(2 * m_pad * c_pad * x_bytes
                           + n_row_steps * 2 * c_pad * c_pad * w_bytes + 24 * c_pad),
    )

    return pl.pallas_call(
        kernel,
        out_shape=jax.ShapeDtypeStruct((m_pad, c_pad), x_dtype),
        grid_spec=pltpu.PrefetchScalarGridSpec(
            num_scalar_prefetch=0,
            grid=(n_row_steps, nk),
            in_specs=[
                pl.BlockSpec((tm, c_pad), x_map),                 # x (resident across k)
                pl.BlockSpec((4, c_pad), const_map),              # gamma/beta/b1/b2
                pl.BlockSpec((1, tk), lambda i, k: (0, k)),       # b1 hidden tile
                pl.BlockSpec((c_pad, tk), lambda i, k: (0, k)),   # w1 column slab
                pl.BlockSpec((tk, c_pad), lambda i, k: (k, 0)),   # w2 row slab
            ],
            out_specs=pl.BlockSpec((tm, c_pad), x_map),
            scratch_shapes=[
                pltpu.VMEM((tm, c_pad), mat_dtype),    # h = LayerNorm(x)
                pltpu.VMEM((tm, c_pad), jnp.float32),  # f32 accumulator for 2nd matmul
            ],
        ),
        compiler_params=pltpu.CompilerParams(
            dimension_semantics=("parallel", "arbitrary"),
            vmem_limit_bytes=vmem_limit,
        ),
        cost_estimate=cost,
    )


# ----------------------------------------------------------------------------
# Public wrapper
# ----------------------------------------------------------------------------

def resblock_forward(x, gamma, beta, w1, b1, w2, b2, *,
                     tm=None, tk=None, use_bf16_matmul=True,
                     force_weight_tiling=False):
    """x: (..., C). w1/w2 are (C, C) stored as (in, out) so y = h @ w + b
    (equivalent to PyTorch y = h @ W.T + b with W of shape (out, in))."""
    orig_shape = x.shape
    C = orig_shape[-1]
    M = 1
    for d in orig_shape[:-1]:
        M *= d

    c_pad = _round_up(C, LANE)
    x_dtype = x.dtype
    mat_dtype = jnp.bfloat16 if use_bf16_matmul else jnp.float32
    approx_silu = bool(use_bf16_matmul)   # keep the f32 path near-exact

    plan = _plan(M, c_pad, x_dtype, mat_dtype, tm, tk,
                 force_weight_tiling, weight_buf_factor=1)
    tm_eff = plan["tm"]
    m_pad = _round_up(M, tm_eff)
    pad_c = c_pad - C

    def pad_x(rows):
        x2 = x.reshape(M, C)
        if (rows - M) or pad_c:
            x2 = jnp.pad(x2, ((0, rows - M), (0, pad_c)))
        return x2

    def pad_vec(v):
        v = v.astype(jnp.float32).reshape(C)
        return jnp.pad(v, (0, pad_c)) if pad_c else v

    # Pack the four (C,) params into one (4, C_pad) grid-invariant block (one DMA).
    params = jnp.stack([pad_vec(gamma), pad_vec(beta), pad_vec(b1), pad_vec(b2)], axis=0)

    def pad_w(w):
        w = w.astype(jnp.float32)
        if pad_c:
            w = jnp.pad(w, ((0, pad_c), (0, pad_c)))
        return w.astype(mat_dtype)

    w1p, w2p = pad_w(w1), pad_w(w2)

    if plan["use_tiled"]:
        kernel = _make_tiled_kernel(C, c_pad, mat_dtype, approx_silu)
        b1_row = pad_vec(b1).reshape(1, c_pad)
        call = _build_tiled_call(kernel, m_pad, c_pad, tm_eff, plan["tk"],
                                 x_dtype, mat_dtype, plan["vmem_limit"])
        out2 = call(pad_x(m_pad), params, b1_row, w1p, w2p)
    else:
        kernel = _make_resident_kernel(C, c_pad, mat_dtype, approx_silu)
        try:
            call = _build_resident_call(kernel, m_pad, c_pad, tm_eff, x_dtype,
                                        mat_dtype, plan["vmem_limit"],
                                        single_buffer_weights=True)
            out2 = call(pad_x(m_pad), params, w1p, w2p)
        except Exception:
            # This JAX build rejected pipeline_mode=pl.Buffered(1) on the weight
            # specs: re-plan with DOUBLE-buffered weights (may shrink tm or switch
            # to the hidden-tiled path) instead of reusing the single-buffer plan.
            plan2 = _plan(M, c_pad, x_dtype, mat_dtype, tm, tk,
                          force_weight_tiling, weight_buf_factor=2)
            tm_eff = plan2["tm"]
            m_pad = _round_up(M, tm_eff)
            if plan2["use_tiled"]:
                kernel2 = _make_tiled_kernel(C, c_pad, mat_dtype, approx_silu)
                b1_row = pad_vec(b1).reshape(1, c_pad)
                call = _build_tiled_call(kernel2, m_pad, c_pad, tm_eff, plan2["tk"],
                                         x_dtype, mat_dtype, plan2["vmem_limit"])
                out2 = call(pad_x(m_pad), params, b1_row, w1p, w2p)
            else:
                call = _build_resident_call(kernel, m_pad, c_pad, tm_eff, x_dtype,
                                            mat_dtype, plan2["vmem_limit"],
                                            single_buffer_weights=False)
                out2 = call(pad_x(m_pad), params, w1p, w2p)

    if (m_pad - M) or pad_c:
        out2 = out2[:M, :C]
    return out2.reshape(orig_shape)


# ----------------------------------------------------------------------------
# Pure-JAX reference (PyTorch semantics) and smoke tests
# ----------------------------------------------------------------------------

def reference_forward(x, gamma, beta, w1, b1, w2, b2):
    xf = x.astype(jnp.float32)
    mu = jnp.mean(xf, axis=-1, keepdims=True)
    var = jnp.mean((xf - mu) ** 2, axis=-1, keepdims=True)
    h = (xf - mu) / jnp.sqrt(var + EPS)
    h = h * gamma + beta
    h = h @ w1 + b1
    h = h * jax.nn.sigmoid(h)
    h = h @ w2 + b2
    return (xf + h).astype(x.dtype)


def _make_params(key, C):
    k_w1, k_b1, k_w2, k_b2, k_g, k_bt = jax.random.split(key, 6)
    gamma = 1.0 + 0.1 * jax.random.normal(k_g, (C,), dtype=jnp.float32)
    beta = 0.1 * jax.random.normal(k_bt, (C,), dtype=jnp.float32)
    w1 = jax.random.normal(k_w1, (C, C), dtype=jnp.float32) * 0.02
    b1 = jax.random.normal(k_b1, (C,), dtype=jnp.float32) * 0.01
    w2 = jax.random.normal(k_w2, (C, C), dtype=jnp.float32) * 0.02
    b2 = jax.random.normal(k_b2, (C,), dtype=jnp.float32) * 0.01
    return gamma, beta, w1, b1, w2, b2


if __name__ == "__main__":
    key = jax.random.PRNGKey(0)
    k_x, k_p, k_x2, k_xt, k_pt = jax.random.split(key, 5)

    # --- small-C smoke tests (resident-weight path, C < 128 exercises lane padding)
    B, N, C = 2, 8, 32
    x = jax.random.normal(k_x, (B, N, C), dtype=jnp.float32)
    gamma, beta, w1, b1, w2, b2 = _make_params(k_p, C)
    ref = reference_forward(x, gamma, beta, w1, b1, w2, b2)

    # f32-matmul path: near-exact vs. the PyTorch-semantics reference.
    out_f32 = jax.block_until_ready(
        resblock_forward(x, gamma, beta, w1, b1, w2, b2, use_bf16_matmul=False))
    assert out_f32.shape == x.shape and out_f32.dtype == x.dtype
    assert jnp.allclose(out_f32, ref, atol=1e-3, rtol=1e-3), "f32 path mismatch"

    # Default path: bf16 matmul inputs/weights with f32 accumulation.
    out = jax.block_until_ready(resblock_forward(x, gamma, beta, w1, b1, w2, b2))
    assert out.shape == x.shape and out.dtype == x.dtype
    assert jnp.allclose(out, ref, atol=2e-2, rtol=2e-2), "bf16 path mismatch"

    # Ragged row count (M not a multiple of the tile) exercises row padding.
    x_rag = jax.random.normal(k_x2, (3, 5, C), dtype=jnp.float32)
    ref_rag = reference_forward(x_rag, gamma, beta, w1, b1, w2, b2)
    out_rag = jax.block_until_ready(
        resblock_forward(x_rag, gamma, beta, w1, b1, w2, b2))
    assert out_rag.shape == x_rag.shape
    assert jnp.allclose(out_rag, ref_rag, atol=2e-2, rtol=2e-2), "ragged-M mismatch"

    # --- hidden-dim-tiled weight path (forced; tk=128 -> 2 inner grid steps) ------
    C2 = 256
    x_t = jax.random.normal(k_xt, (B, N, C2), dtype=jnp.float32)
    gamma2, beta2, w1b, b1b, w2b, b2b = _make_params(k_pt, C2)
    ref_t = reference_forward(x_t, gamma2, beta2, w1b, b1b, w2b, b2b)
    out_t = jax.block_until_ready(
        resblock_forward(x_t, gamma2, beta2, w1b, b1b, w2b, b2b,
                         force_weight_tiling=True, tk=128))
    assert out_t.shape == x_t.shape
    assert jnp.allclose(out_t, ref_t, atol=2e-2, rtol=2e-2), "tiled-weight mismatch"

    print("KERNEL_OK")
</pallas_src>

<mosaic_0001>
module attributes {stable_mosaic.version = 11 : i64} {
  func.func @kernel(%arg0: i32, %arg1: memref<16x128xf32, #tpu.memory_space<vmem>>, %arg2: memref<4x128xf32, #tpu.memory_space<vmem>>, %arg3: memref<128x128xf32, #tpu.memory_space<vmem>>, %arg4: memref<128x128xf32, #tpu.memory_space<vmem>>, %arg5: memref<16x128xf32, #tpu.memory_space<vmem>>) attributes {dimension_semantics = [#tpu.dimension_semantics<parallel>], iteration_bounds = array<i64: 1>, scalar_prefetch = 0 : i64, scratch_operands = 0 : i64, tpu.core_type = #tpu.core_type<tc>, window_params = [{transform_indices = @transform_0, window_bounds = array<i64: 16, 128>}, {pipeline_mode = #tpu.pipeline_mode<synchronous>, transform_indices = @transform_1, window_bounds = array<i64: 4, 128>}, {pipeline_mode = #tpu.pipeline_mode<synchronous>, transform_indices = @transform_2, window_bounds = array<i64: 128, 128>}, {pipeline_mode = #tpu.pipeline_mode<synchronous>, transform_indices = @transform_3, window_bounds = array<i64: 128, 128>}, {transform_indices = @transform_4, window_bounds = array<i64: 16, 128>}]} {
    %c0 = arith.constant 0 : index
    %c0_0 = arith.constant 0 : index
    %0 = vector.load %arg1[%c0, %c0_0] : memref<16x128xf32, #tpu.memory_space<vmem>>, vector<16x128xf32>
    %c0_1 = arith.constant 0 : index
    %c0_2 = arith.constant 0 : index
    %1 = vector.load %arg2[%c0_1, %c0_2] : memref<4x128xf32, #tpu.memory_space<vmem>>, vector<1x128xf32>
    %c1 = arith.constant 1 : index
    %c0_3 = arith.constant 0 : index
    %2 = vector.load %arg2[%c1, %c0_3] : memref<4x128xf32, #tpu.memory_space<vmem>>, vector<1x128xf32>
    %c2 = arith.constant 2 : index
    %c0_4 = arith.constant 0 : index
    %3 = vector.load %arg2[%c2, %c0_4] : memref<4x128xf32, #tpu.memory_space<vmem>>, vector<1x128xf32>
    %c3 = arith.constant 3 : index
    %c0_5 = arith.constant 0 : index
    %4 = vector.load %arg2[%c3, %c0_5] : memref<4x128xf32, #tpu.memory_space<vmem>>, vector<1x128xf32>
    %cst = arith.constant dense<0.000000e+00> : vector<16xf32>
    %5 = vector.multi_reduction <add>, %0, %cst [1] : vector<16x128xf32> to vector<16xf32>
    %6 = vector.shape_cast %5 : vector<16xf32> to vector<16x1xf32>
    %cst_6 = arith.constant 3.125000e-02 : f32
    %7 = vector.broadcast %cst_6 : f32 to vector<16x1xf32>
    %8 = arith.mulf %6, %7 : vector<16x1xf32>
    %9 = vector.broadcast %8 : vector<16x1xf32> to vector<16x128xf32>
    %10 = arith.subf %0, %9 : vector<16x128xf32>
    %11 = tpu.iota {dimensions = array<i32: 1>} : vector<16x128xi32>
    %c32_i32 = arith.constant 32 : i32
    %12 = vector.broadcast %c32_i32 : i32 to vector<16x128xi32>
    %13 = arith.cmpi slt, %11, %12 : vector<16x128xi32>
    %cst_7 = arith.constant 0.000000e+00 : f32
    %14 = vector.broadcast %cst_7 : f32 to vector<16x128xf32>
    %15 = arith.select %13, %10, %14 : vector<16x128xi1>, vector<16x128xf32>
    %16 = arith.mulf %15, %15 : vector<16x128xf32>
    %cst_8 = arith.constant dense<0.000000e+00> : vector<16xf32>
    %17 = vector.multi_reduction <add>, %16, %cst_8 [1] : vector<16x128xf32> to vector<16xf32>
    %18 = vector.shape_cast %17 : vector<16xf32> to vector<16x1xf32>
    %cst_9 = arith.constant 3.125000e-02 : f32
    %19 = vector.broadcast %cst_9 : f32 to vector<16x1xf32>
    %20 = arith.mulf %18, %19 : vector<16x1xf32>
    %cst_10 = arith.constant 9.99999997E-7 : f32
    %21 = vector.broadcast %cst_10 : f32 to vector<16x1xf32>
    %22 = arith.addf %20, %21 : vector<16x1xf32>
    %23 = math.rsqrt %22 : vector<16x1xf32>
    %24 = vector.broadcast %23 : vector<16x1xf32> to vector<16x128xf32>
    %25 = arith.mulf %15, %24 : vector<16x128xf32>
    %26 = vector.broadcast %1 : vector<1x128xf32> to vector<16x128xf32>
    %27 = arith.mulf %25, %26 : vector<16x128xf32>
    %28 = vector.broadcast %2 : vector<1x128xf32> to vector<16x128xf32>
    %29 = arith.addf %27, %28 : vector<16x128xf32>
    %c0_11 = arith.constant 0 : index
    %c0_12 = arith.constant 0 : index
    %30 = vector.load %arg3[%c0_11, %c0_12] : memref<128x128xf32, #tpu.memory_space<vmem>>, vector<128x128xf32>
    %cst_13 = arith.constant dense<0.000000e+00> : vector<16x128xf32>
    %31 = tpu.matmul %29, %30, %cst_13 {dimension_numbers = #tpu.dot_dimension_numbers<[1], [0], [0], [1], [0, 0, 1, 1], [], []>} : vector<16x128xf32>, vector<128x128xf32>, vector<16x128xf32> -> vector<16x128xf32>
    %32 = vector.broadcast %3 : vector<1x128xf32> to vector<16x128xf32>
    %33 = arith.addf %31, %32 : vector<16x128xf32>
    %cst_14 = arith.constant 0.000000e+00 : f32
    %34 = vector.broadcast %cst_14 : f32 to vector<16x128xf32>
    %35 = arith.subf %34, %33 : vector<16x128xf32>
    %36 = math.exp %35 : vector<16x128xf32>
    %cst_15 = arith.constant 1.000000e+00 : f32
    %37 = vector.broadcast %cst_15 : f32 to vector<16x128xf32>
    %38 = arith.addf %37, %36 : vector<16x128xf32>
    %cst_16 = arith.constant 1.000000e+00 : f32
    %39 = vector.broadcast %cst_16 : f32 to vector<16x128xf32>
    %40 = arith.divf %39, %38 : vector<16x128xf32>
    %41 = arith.mulf %33, %40 : vector<16x128xf32>
    %c0_17 = arith.constant 0 : index
    %c0_18 = arith.constant 0 : index
    %42 = vector.load %arg4[%c0_17, %c0_18] : memref<128x128xf32, #tpu.memory_space<vmem>>, vector<128x128xf32>
    %cst_19 = arith.constant dense<0.000000e+00> : vector<16x128xf32>
    %43 = tpu.matmul %41, %42, %cst_19 {dimension_numbers = #tpu.dot_dimension_numbers<[1], [0], [0], [1], [0, 0, 1, 1], [], []>} : vector<16x128xf32>, vector<128x128xf32>, vector<16x128xf32> -> vector<16x128xf32>
    %44 = vector.broadcast %4 : vector<1x128xf32> to vector<16x128xf32>
    %45 = arith.addf %43, %44 : vector<16x128xf32>
    %c0_20 = arith.constant 0 : index
    %c0_21 = arith.constant 0 : index
    %46 = vector.load %arg1[%c0_20, %c0_21] : memref<16x128xf32, #tpu.memory_space<vmem>>, vector<16x128xf32>
    %47 = arith.addf %46, %45 : vector<16x128xf32>
    %c0_22 = arith.constant 0 : index
    %c0_23 = arith.constant 0 : index
    %48 = vector.load %arg5[%c0_22, %c0_23] : memref<16x128xf32, #tpu.memory_space<vmem>>, vector<16x128xf32>
    tpu.vector_store %arg5[%c0_22, %c0_23], %47 {strides = array<i32>} : memref<16x128xf32, #tpu.memory_space<vmem>>, vector<16x128xf32>,
    return
  }
  func.func @transform_0(%arg0: i32) -> (i32, i32) {
    %c0_i32 = arith.constant 0 : i32
    %c0_i32_0 = arith.constant 0 : i32
    return %arg0, %c0_i32 : i32, i32
  }
  func.func @transform_1(%arg0: i32) -> (i32, i32) {
    %c0_i32 = arith.constant 0 : i32
    %c0_i32_0 = arith.constant 0 : i32
    %c0_i32_1 = arith.constant 0 : i32
    return %c0_i32, %c0_i32_0 : i32, i32
  }
  func.func @transform_2(%arg0: i32) -> (i32, i32) {
    %c0_i32 = arith.constant 0 : i32
    %c0_i32_0 = arith.constant 0 : i32
    %c0_i32_1 = arith.constant 0 : i32
    return %c0_i32, %c0_i32_0 : i32, i32
  }
  func.func @transform_3(%arg0: i32) -> (i32, i32) {
    %c0_i32 = arith.constant 0 : i32
    %c0_i32_0 = arith.constant 0 : i32
    %c0_i32_1 = arith.constant 0 : i32
    return %c0_i32, %c0_i32_0 : i32, i32
  }
  func.func @transform_4(%arg0: i32) -> (i32, i32) {
    %c0_i32 = arith.constant 0 : i32
    %c0_i32_0 = arith.constant 0 : i32
    return %arg0, %c0_i32 : i32, i32
  }
}

module attributes {stable_mosaic.version = 11 : i64} {
  func.func @kernel(%arg0: i32, %arg1: memref<16x128xf32, #tpu.memory_space<vmem>>, %arg2: memref<4x128xf32, #tpu.memory_space<vmem>>, %arg3: memref<128x128xf32, #tpu.memory_space<vmem>>, %arg4: memref<128x128xf32, #tpu.memory_space<vmem>>, %arg5: memref<16x128xf32, #tpu.memory_space<vmem>>) attributes {dimension_semantics = [#tpu.dimension_semantics<parallel>], iteration_bounds = array<i64: 1>, scalar_prefetch = 0 : i64, scratch_operands = 0 : i64, tpu.core_type = #tpu.core_type<tc>, window_params = [{transform_indices = @transform_0, window_bounds = array<i64: 16, 128>}, {pipeline_mode = #tpu.pipeline_mode<synchronous>, transform_indices = @transform_1, window_bounds = array<i64: 4, 128>}, {pipeline_mode = #tpu.pipeline_mode<synchronous>, transform_indices = @transform_2, window_bounds = array<i64: 128, 128>}, {pipeline_mode = #tpu.pipeline_mode<synchronous>, transform_indices = @transform_3, window_bounds = array<i64: 128, 128>}, {transform_indices = @transform_4, window_bounds = array<i64: 16, 128>}]} {
    %c0 = arith.constant 0 : index
    %c0_0 = arith.constant 0 : index
    %0 = vector.load %arg1[%c0, %c0_0] : memref<16x128xf32, #tpu.memory_space<vmem>>, vector<16x128xf32>
    %c0_1 = arith.constant 0 : index
    %c0_2 = arith.constant 0 : index
    %1 = vector.load %arg2[%c0_1, %c0_2] : memref<4x128xf32, #tpu.memory_space<vmem>>, vector<1x128xf32>
    %c1 = arith.constant 1 : index
    %c0_3 = arith.constant 0 : index
    %2 = vector.load %arg2[%c1, %c0_3] : memref<4x128xf32, #tpu.memory_space<vmem>>, vector<1x128xf32>
    %c2 = arith.constant 2 : index
    %c0_4 = arith.constant 0 : index
    %3 = vector.load %arg2[%c2, %c0_4] : memref<4x128xf32, #tpu.memory_space<vmem>>, vector<1x128xf32>
    %c3 = arith.constant 3 : index
    %c0_5 = arith.constant 0 : index
    %4 = vector.load %arg2[%c3, %c0_5] : memref<4x128xf32, #tpu.memory_space<vmem>>, vector<1x128xf32>
    %cst = arith.constant dense<0.000000e+00> : vector<16xf32>
    %5 = vector.multi_reduction <add>, %0, %cst [1] : vector<16x128xf32> to vector<16xf32>
    %6 = vector.shape_cast %5 : vector<16xf32> to vector<16x1xf32>
    %cst_6 = arith.constant 3.125000e-02 : f32
    %7 = vector.broadcast %cst_6 : f32 to vector<16x1xf32>
    %8 = arith.mulf %6, %7 : vector<16x1xf32>
    %9 = vector.broadcast %8 : vector<16x1xf32> to vector<16x128xf32>
    %10 = arith.subf %0, %9 : vector<16x128xf32>
    %11 = tpu.iota {dimensions = array<i32: 1>} : vector<16x128xi32>
    %c32_i32 = arith.constant 32 : i32
    %12 = vector.broadcast %c32_i32 : i32 to vector<16x128xi32>
    %13 = arith.cmpi slt, %11, %12 : vector<16x128xi32>
    %cst_7 = arith.constant 0.000000e+00 : f32
    %14 = vector.broadcast %cst_7 : f32 to vector<16x128xf32>
    %15 = arith.select %13, %10, %14 : vector<16x128xi1>, vector<16x128xf32>
    %16 = arith.mulf %15, %15 : vector<16x128xf32>
    %cst_8 = arith.constant dense<0.000000e+00> : vector<16xf32>
    %17 = vector.multi_reduction <add>, %16, %cst_8 [1] : vector<16x128xf32> to vector<16xf32>
    %18 = vector.shape_cast %17 : vector<16xf32> to vector<16x1xf32>
    %cst_9 = arith.constant 3.125000e-02 : f32
    %19 = vector.broadcast %cst_9 : f32 to vector<16x1xf32>
    %20 = arith.mulf %18, %19 : vector<16x1xf32>
    %cst_10 = arith.constant 9.99999997E-7 : f32
    %21 = vector.broadcast %cst_10 : f32 to vector<16x1xf32>
    %22 = arith.addf %20, %21 : vector<16x1xf32>
    %23 = math.rsqrt %22 : vector<16x1xf32>
    %24 = vector.broadcast %23 : vector<16x1xf32> to vector<16x128xf32>
    %25 = arith.mulf %15, %24 : vector<16x128xf32>
    %26 = vector.broadcast %1 : vector<1x128xf32> to vector<16x128xf32>
    %27 = arith.mulf %25, %26 : vector<16x128xf32>
    %28 = vector.broadcast %2 : vector<1x128xf32> to vector<16x128xf32>
    %29 = arith.addf %27, %28 : vector<16x128xf32>
    %c0_11 = arith.constant 0 : index
    %c0_12 = arith.constant 0 : index
    %30 = vector.load %arg3[%c0_11, %c0_12] : memref<128x128xf32, #tpu.memory_space<vmem>>, vector<128x128xf32>
    %cst_13 = arith.constant dense<0.000000e+00> : vector<16x128xf32>
    %31 = tpu.matmul %29, %30, %cst_13 {dimension_numbers = #tpu.dot_dimension_numbers<[1], [0], [0], [1], [0, 0, 1, 1], [], []>} : vector<16x128xf32>, vector<128x128xf32>, vector<16x128xf32> -> vector<16x128xf32>
    %32 = vector.broadcast %3 : vector<1x128xf32> to vector<16x128xf32>
    %33 = arith.addf %31, %32 : vector<16x128xf32>
    %cst_14 = arith.constant 0.000000e+00 : f32
    %34 = vector.broadcast %cst_14 : f32 to vector<16x128xf32>
    %35 = arith.subf %34, %33 : vector<16x128xf32>
    %36 = math.exp %35 : vector<16x128xf32>
    %cst_15 = arith.constant 1.000000e+00 : f32
    %37 = vector.broadcast %cst_15 : f32 to vector<16x128xf32>
    %38 = arith.addf %37, %36 : vector<16x128xf32>
    %cst_16 = arith.constant 1.000000e+00 : f32
    %39 = vector.broadcast %cst_16 : f32 to vector<16x128xf32>
    %40 = arith.divf %39, %38 : vector<16x128xf32>
    %41 = arith.mulf %33, %40 : vector<16x128xf32>
    %c0_17 = arith.constant 0 : index
    %c0_18 = arith.constant 0 : index
    %42 = vector.load %arg4[%c0_17, %c0_18] : memref<128x128xf32, #tpu.memory_space<vmem>>, vector<128x128xf32>
    %cst_19 = arith.constant dense<0.000000e+00> : vector<16x128xf32>
    %43 = tpu.matmul %41, %42, %cst_19 {dimension_numbers = #tpu.dot_dimension_numbers<[1], [0], [0], [1], [0, 0, 1, 1], [], []>} : vector<16x128xf32>, vector<128x128xf32>, vector<16x128xf32> -> vector<16x128xf32>
    %44 = vector.broadcast %4 : vector<1x128xf32> to vector<16x128xf32>
    %45 = arith.addf %43, %44 : vector<16x128xf32>
    %c0_20 = arith.constant 0 : index
    %c0_21 = arith.constant 0 : index
    %46 = vector.load %arg1[%c0_20, %c0_21] : memref<16x128xf32, #tpu.memory_space<vmem>>, vector<16x128xf32>
    %47 = arith.addf %46, %45 : vector<16x128xf32>
    %c0_22 = arith.constant 0 : index
    %c0_23 = arith.constant 0 : index
    %48 = vector.load %arg5[%c0_22, %c0_23] : memref<16x128xf32, #tpu.memory_space<vmem>>, vector<16x128xf32>
    tpu.vector_store %arg5[%c0_22, %c0_23], %47 {strides = array<i32>} : memref<16x128xf32, #tpu.memory_space<vmem>>, vector<16x128xf32>,
    return
  }
  func.func @transform_0(%arg0: i32) -> (i32, i32) {
    %c0_i32 = arith.constant 0 : i32
    %c0_i32_0 = arith.constant 0 : i32
    return %arg0, %c0_i32 : i32, i32
  }
  func.func @transform_1(%arg0: i32) -> (i32, i32) {
    %c0_i32 = arith.constant 0 : i32
    %c0_i32_0 = arith.constant 0 : i32
    %c0_i32_1 = arith.constant 0 : i32
    return %c0_i32, %c0_i32_0 : i32, i32
  }
  func.func @transform_2(%arg0: i32) -> (i32, i32) {
    %c0_i32 = arith.constant 0 : i32
    %c0_i32_0 = arith.constant 0 : i32
    %c0_i32_1 = arith.constant 0 : i32
    return %c0_i32, %c0_i32_0 : i32, i32
  }
  func.func @transform_3(%arg0: i32) -> (i32, i32) {
    %c0_i32 = arith.constant 0 : i32
    %c0_i32_0 = arith.constant 0 : i32
    %c0_i32_1 = arith.constant 0 : i32
    return %c0_i32, %c0_i32_0 : i32, i32
  }
  func.func @transform_4(%arg0: i32) -> (i32, i32) {
    %c0_i32 = arith.constant 0 : i32
    %c0_i32_0 = arith.constant 0 : i32
    return %arg0, %c0_i32 : i32, i32
  }
}

</mosaic_0001>

<bundles_post_ra>
// kernel: tpu_custom_call.1
= control target key start
LH: loop header
LB: loop body
LE: loop exit
PB: predicated region body
PF: predicated region fallthrough
CT: control target
= control target key end

     0   :  { %9 = vsyncpa [#allocation3], 0  ;;  %s543_s0 = inlined_call_operand.hbm [shape: f32[16,128], index: 0, kind: input, shape index: {}]   ;;  %s544_s1 = inlined_call_operand.hbm [shape: f32[4,128], index: 1, kind: input, shape index: {}]   ;;  %s545_s2 = inlined_call_operand.hbm [shape: f32[128,128], index: 2, kind: input, shape index: {}]   ;;  %s546_s3 = inlined_call_operand.hbm [shape: f32[128,128], index: 3, kind: input, shape index: {}]   ;;  %s547_s4 = inlined_call_operand.hbm [shape: f32[16,128], index: 4, kind: output, shape index: {}]  }
   0x1   :  { %10 = vsyncpa [#allocation6], 0 }
   0x2   :  { %11 = vsyncpa [#allocation9], 0  ;;  %s31_s17 = sshll.u32 %s544_s1, 4  ;;  %s32_s17 = int_to_ptr.hbm [resolvable:$true] %s31_s17 }
   0x3   :  { %12 = vsyncpa [#allocation4], 0  ;;  %s464_s18 = smov [#allocation5]   ;;  %s17_s22 = sshll.u32 %s543_s0, 4  ;;  %s18_s22 = int_to_ptr.hbm [resolvable:$true] %s17_s22 }
   0x4   :  { %s33_s19 = sshll.u32 %s464_s18, 4  ;;  %s465_s23 = smov [#allocation2]   ;;  %s34_s19 = int_to_ptr.vmem [resolvable:$true] %s33_s19 }
   0x5   :  { %36 = dma.hbm_to_vmem [thread:$0]  %s32_s17, 64, %s34_s19, [#allocation6]  }
   0x6   :  { %s19_s24 = sshll.u32 %s465_s23, 4  ;;  %s466_s25 = smov 128   ;;  %s20_s24 = int_to_ptr.vmem [resolvable:$true] %s19_s24 }
   0x7   :  { %s467_s26 = smov 8   ;;  %s41_s28 = sshll.u32 %s545_s2, 4  ;;  %s42_s28 = int_to_ptr.hbm [resolvable:$true] %s41_s28 }
   0x8   :  { %25 = dma.hbm_to_vmem [thread:$0]  %s18_s22, 256, %s20_s24, [#allocation3], %s466_s25, %s466_s25, %s467_s26  }
   0x9   :  { %s468_s29 = smov [#allocation7]   ;;  %s54_s6 = sshll.u32 %s546_s3, 4  ;;  %s55_s6 = int_to_ptr.hbm [resolvable:$true] %s54_s6 }
   0xa   :  { %s43_s30 = sshll.u32 %s468_s29, 4  ;;  %s469_s7 = smov [#allocation8]   ;;  %s44_s30 = int_to_ptr.vmem [resolvable:$true] %s43_s30 }
   0xb   :  { %49 = dma.hbm_to_vmem [thread:$0]  %s42_s28, 2048, %s44_s30, [#allocation6], %s466_s25, %s466_s25, %s467_s26  }
   0xc   :  { %s56_s8 = sshll.u32 %s469_s7, 4  ;;  %s57_s8 = int_to_ptr.vmem [resolvable:$true] %s56_s8 }
   0xd   :  { %62 = dma.hbm_to_vmem [thread:$0]  %s55_s6, 2048, %s57_s8, [#allocation9], %s466_s25, %s466_s25, %s467_s26  }
   0xe   :  { %456 = dma.done.wait [#allocation3], 256  }
   0xf   :  { %457 = vsyncadd [#allocation3], 4294967040 }
  0x10   :  { %458 = dma.done.wait [#allocation6], 2112  }
  0x11   :  { %459 = vsyncadd [#allocation6], 4294965184 }
  0x12   :  { %460 = dma.done.wait [#allocation9], 2048  }
  0x13   :  { %461 = vsyncadd [#allocation9], 4294965248  ;;  %v517_v0 = vld [vmem:[#allocation2 + $0x8] sm:$0xff]  ;;  %v520_v1 = vld [vmem:[#allocation2] sm:$0xff]  ;;  %v93_v4 = vlaneseq  ;;  %s470_s2 = smov [#allocation10]   ;;  %s266_s11 = sshll.u32 %s547_s4, 4  ;;  %s267_s11 = int_to_ptr.hbm [resolvable:$true] %s266_s11 }
  0x14   :  { %87 = vadd.xlane.f32.xlu0 %v517_v0  ;;  %v151_v2 = vld [vmem:[#allocation7 + $0x78] sm:$0xff]  ;;  %v150_v3 = vld [vmem:[#allocation7 + $0x70] sm:$0xff]  ;;  %v149_v16 = vld [vmem:[#allocation7 + $0x68] sm:$0xff]  ;;  %s264_s3 = sshll.u32 %s470_s2, 4  ;;  %s265_s3 = int_to_ptr.vmem [resolvable:$true] %s264_s3 }
  0x15   :  { %281 = vmatpush.msra.mxu2 %v151_v2  ;;  %153 = vmatpush.msra.mxu0 %v151_v2  ;;  %v94_v5 = vand.u32 127, %v93_v4  ;;  %v148_v17 = vld [vmem:[#allocation7 + $0x60] sm:$0xff]  ;;  %v147_v18 = vld [vmem:[#allocation7 + $0x58] sm:$0xff]  ;;  %v146_v19 = vld [vmem:[#allocation7 + $0x50] sm:$0xff] }
  0x16   :  { %v145_v20 = vld [vmem:[#allocation7 + $0x48] sm:$0xff]  ;;  %v144_v21 = vld [vmem:[#allocation7 + $0x40] sm:$0xff]  ;;  %v143_v22 = vld [vmem:[#allocation7 + $0x38] sm:$0xff] }
  0x17   :  { %282 = vmatpush.msra.mxu2 %v150_v3  ;;  %154 = vmatpush.msra.mxu0 %v150_v3  ;;  %vm95_vm0 = vcmp.lt.s32.totalorder %v94_v5, 32  ;;  %v142_v23 = vld [vmem:[#allocation7 + $0x30] sm:$0xff]  ;;  %v141_v24 = vld [vmem:[#allocation7 + $0x28] sm:$0xff]  ;;  %v140_v25 = vld [vmem:[#allocation7 + $0x20] sm:$0xff] }
  0x18   :  { %v139_v26 = vld [vmem:[#allocation7 + $0x18] sm:$0xff]  ;;  %v138_v27 = vld [vmem:[#allocation7 + $0x10] sm:$0xff]  ;;  %v137_v28 = vld [vmem:[#allocation7 + $0x8] sm:$0xff] }
  0x19   :  { %283 = vmatpush.msra.mxu2 %v149_v16  ;;  %155 = vmatpush.msra.mxu0 %v149_v16  ;;  %v136_v29 = vld [vmem:[#allocation7] sm:$0xff]  ;;  %v320_v44 = vld [vmem:[#allocation5] ss:$0 sm:$0xff]  ;;  %v321_v48 = vld [vmem:[#allocation5 + $0x1] ss:$0 sm:$0xff] }
  0x1a   :  { %v231_v58 = vld [vmem:[#allocation8 + $0x78] sm:$0xff]  ;;  %v230_v59 = vld [vmem:[#allocation8 + $0x70] sm:$0xff]  ;;  %v229_v60 = vld [vmem:[#allocation8 + $0x68] sm:$0xff] }
  0x1b   :  { %284 = vmatpush.msra.mxu2 %v148_v17  ;;  %156 = vmatpush.msra.mxu0 %v148_v17  ;;  %v228_v61 = vld [vmem:[#allocation8 + $0x60] sm:$0xff]  ;;  %v227_v62 = vld [vmem:[#allocation8 + $0x58] sm:$0xff]  ;;  %v226_v63 = vld [vmem:[#allocation8 + $0x50] sm:$0xff] }
  0x1c   :  { %85 = vadd.xlane.f32.xlu0 %v520_v1  ;;  %297 = vmatpush.msra.mxu3 %v231_v58  ;;  %v225_v2 = vld [vmem:[#allocation8 + $0x48] sm:$0xff]  ;;  %v224_v3 = vld [vmem:[#allocation8 + $0x40] sm:$0xff]  ;;  %v223_v4 = vld [vmem:[#allocation8 + $0x38] sm:$0xff] }
  0x1d   :  { %285 = vmatpush.msra.mxu2 %v147_v18  ;;  %157 = vmatpush.msra.mxu0 %v147_v18  ;;  %v222_v5 = vld [vmem:[#allocation8 + $0x30] sm:$0xff] }
  0x1e   :  { %233 = vmatpush.msra.mxu1 %v231_v58  ;;  %298 = vmatpush.msra.mxu3 %v230_v59 }
  0x1f   :  { %286 = vmatpush.msra.mxu2 %v146_v19  ;;  %158 = vmatpush.msra.mxu0 %v146_v19 }
  0x20   :  { %234 = vmatpush.msra.mxu1 %v230_v59  ;;  %299 = vmatpush.msra.mxu3 %v229_v60 }
  0x21   :  { %287 = vmatpush.msra.mxu2 %v145_v20  ;;  %159 = vmatpush.msra.mxu0 %v145_v20 }
  0x22   :  { %235 = vmatpush.msra.mxu1 %v229_v60  ;;  %300 = vmatpush.msra.mxu3 %v228_v61 }
  0x23   :  { %288 = vmatpush.msra.mxu2 %v144_v21  ;;  %160 = vmatpush.msra.mxu0 %v144_v21 }
  0x24   :  { %236 = vmatpush.msra.mxu1 %v228_v61  ;;  %301 = vmatpush.msra.mxu3 %v227_v62 }
  0x25   :  { %289 = vmatpush.msra.mxu2 %v143_v22  ;;  %161 = vmatpush.msra.mxu0 %v143_v22 }
  0x26   :  { %237 = vmatpush.msra.mxu1 %v227_v62  ;;  %302 = vmatpush.msra.mxu3 %v226_v63 }
  0x27   :  { %290 = vmatpush.msra.mxu2 %v142_v23  ;;  %162 = vmatpush.msra.mxu0 %v142_v23 }
  0x28   :  { %238 = vmatpush.msra.mxu1 %v226_v63  ;;  %303 = vmatpush.msra.mxu3 %v225_v2 }
  0x29   :  { %291 = vmatpush.msra.mxu2 %v141_v24  ;;  %163 = vmatpush.msra.mxu0 %v141_v24 }
  0x2a   :  { %239 = vmatpush.msra.mxu1 %v225_v2  ;;  %304 = vmatpush.msra.mxu3 %v224_v3 }
  0x2b   :  { %292 = vmatpush.msra.mxu2 %v140_v25  ;;  %164 = vmatpush.msra.mxu0 %v140_v25 }
  0x2c   :  { %240 = vmatpush.msra.mxu1 %v224_v3  ;;  %305 = vmatpush.msra.mxu3 %v223_v4 }
  0x2d   :  { %293 = vmatpush.msra.mxu2 %v139_v26  ;;  %165 = vmatpush.msra.mxu0 %v139_v26 }
  0x2e   :  { %241 = vmatpush.msra.mxu1 %v223_v4  ;;  %306 = vmatpush.msra.mxu3 %v222_v5 }
  0x2f   :  { %294 = vmatpush.msra.mxu2 %v138_v27  ;;  %166 = vmatpush.msra.mxu0 %v138_v27 }
  0x30   :  { %242 = vmatpush.msra.mxu1 %v222_v5 }
  0x31   :  { %295 = vmatpush.msra.mxu2 %v137_v28  ;;  %167 = vmatpush.msra.mxu0 %v137_v28 }
  0x33   :  { %296 = vmatpush.msra.mxu2 %v136_v29  ;;  %168 = vmatpush.msra.mxu0 %v136_v29 }
  0x87   :  { %v88_v6 = vpop.xlane.xlu0 %87 }
  0x88   :  { %v90_v7 = vmul.f32 0.03125, %v88_v6  ;;  %v221_v6 = vld [vmem:[#allocation8 + $0x28] sm:$0xff] }
  0x89   :  { %307 = vmatpush.msra.mxu3 %v221_v6  ;;  %243 = vmatpush.msra.mxu1 %v221_v6 }
  0x8a   :  { %v92_v8 = vsub.f32 %v517_v0, %v90_v7  ;;  %v220_v7 = vld [vmem:[#allocation8 + $0x20] sm:$0xff] }
  0x8b   :  { %308 = vmatpush.msra.mxu3 %v220_v7  ;;  %244 = vmatpush.msra.mxu1 %v220_v7 }
  0x8c   :  { %v524_v9 = vsel %vm95_vm0, %v92_v8, 0.0  ;;  %v219_v8 = vld [vmem:[#allocation8 + $0x18] sm:$0xff] }
  0x8d   :  { %v99_v10 = vmul.f32 %v524_v9, %v524_v9  ;;  %309 = vmatpush.msra.mxu3 %v219_v8  ;;  %245 = vmatpush.msra.mxu1 %v219_v8 }
  0x8f   :  { %102 = vadd.xlane.f32.xlu1 %v99_v10  ;;  %v86_v11 = vpop.xlane.xlu0 %85  ;;  %v322_v10 = vld [vmem:[#allocation5 + $0x2] ss:$0 sm:$0xff] }
  0x90   :  { %v89_v12 = vmul.f32 0.03125, %v86_v11  ;;  %v217_v11 = vld [vmem:[#allocation8 + $0x8] sm:$0xff] }
  0x92   :  { %v91_v13 = vsub.f32 %v520_v1, %v89_v12  ;;  %v216_v12 = vld [vmem:[#allocation8] sm:$0xff] }
  0x94   :  { %v529_v14 = vsel %vm95_vm0, %v91_v13, 0.0 }
  0x95   :  { %v98_v15 = vmul.f32 %v529_v14, %v529_v14 }
  0x97   :  { %100 = vadd.xlane.f32.xlu1 %v98_v15 }
 0x102   :  { %v103_v30 = vpop.xlane.xlu1 %102 }
 0x103   :  { %v105_v31 = vmul.f32 0.03125, %v103_v30 }
 0x105   :  { %v107_v32 = vadd.f32 1e-06, %v105_v31 }
 0x107   :  { %324 = vrsqrt.f32 %v107_v32  ;;  %vm124_vm2 = vweird.f32 %v107_v32 }
 0x10a   :  { %v101_v33 = vpop.xlane.xlu1 %100 }
 0x10b   :  { %v104_v34 = vmul.f32 0.03125, %v101_v33 }
 0x10d   :  { %v325_v35 = vpop.eup %324  ;;  %v106_v36 = vadd.f32 1e-06, %v104_v34 }
 0x10e   :  { %v119_v37 = vmul.f32 %v325_v35, %v107_v32  ;;  %vm125_vm1 = vweird.f32 %v325_v35 }
 0x10f   :  { %326 = vrsqrt.f32 %v106_v36  ;;  %vm126_vm3 = vmor %vm124_vm2, %vm125_vm1  ;;  %vm114_vm5 = vweird.f32 %v106_v36 }
 0x110   :  { %v120_v38 = vmul.f32 %v325_v35, %v119_v37 }
 0x112   :  { %v121_v39 = vmul.f32 0.5, %v120_v38 }
 0x114   :  { %v122_v40 = vsub.f32 1.5, %v121_v39 }
 0x115   :  { %v327_v41 = vpop.eup %326 }
 0x116   :  { %v123_v42 = vmul.f32 %v325_v35, %v122_v40  ;;  %v109_v43 = vmul.f32 %v327_v41, %v106_v36  ;;  %vm115_vm4 = vweird.f32 %v327_v41 }
 0x117   :  { %vm116_vm6 = vmor %vm114_vm5, %vm115_vm4 }
 0x118   :  { %v110_v45 = vmul.f32 %v327_v41, %v109_v43  ;;  %v127_v46 = vsel %vm126_vm3, %v325_v35, %v123_v42 }
 0x119   :  { %v129_v47 = vmul.f32 %v127_v46, %v524_v9  ;;  %v218_v9 = vld [vmem:[#allocation8 + $0x10] sm:$0xff] }
 0x11a   :  { %v111_v49 = vmul.f32 0.5, %v110_v45  ;;  %310 = vmatpush.msra.mxu3 %v218_v9  ;;  %246 = vmatpush.msra.mxu1 %v218_v9 }
 0x11b   :  { %v132_v50 = vmul.f32 %v320_v44, %v129_v47  ;;  %v323_v47 = vld [vmem:[#allocation5 + $0x3] ss:$0 sm:$0xff] }
 0x11c   :  { %v112_v51 = vsub.f32 1.5, %v111_v49  ;;  %311 = vmatpush.msra.mxu3 %v217_v11  ;;  %247 = vmatpush.msra.mxu1 %v217_v11 }
 0x11d   :  { %v135_v52 = vadd.f32 %v321_v48, %v132_v50 }
 0x11e   :  { %v113_v53 = vmul.f32 %v327_v41, %v112_v51  ;;  %312 = vmatpush.msra.mxu3 %v216_v12  ;;  %248 = vmatpush.msra.mxu1 %v216_v12 }
 0x11f   :  { %172 = vmatmul.f32.vlgmr.msra.gmra.mxu2 %v135_v52 }
 0x120   :  { %v117_v54 = vsel %vm116_vm6, %v327_v41, %v113_v53 }
 0x121   :  { %v128_v55 = vmul.f32 %v117_v54, %v529_v14 }
 0x123   :  { %v131_v56 = vmul.f32 %v320_v44, %v128_v55 }
 0x125   :  { %v134_v57 = vadd.f32 %v321_v48, %v131_v56 }
 0x127   :  { %169 = vmatmul.f32.vlgmr.msra.gmra.mxu0 %v134_v57 }
 0x1a2   :  { %v173_v13 = vpop.f32.mrf.mxu2 }
 0x1a3   :  { %v174_v14 = vadd.f32 %v322_v10, %v173_v13 }
 0x1a4   :  { %v170_v15 = vpop.f32.mrf.mxu0 }
 0x1a5   :  { %v177_v16 = vsub.f32 0.0, %v174_v14  ;;  %v171_v17 = vadd.f32 %v322_v10, %v170_v15 }
 0x1a7   :  { %v180_v18 = vmul.f32 1.442695, %v177_v16  ;;  %v176_v19 = vsub.f32 0.0, %v171_v17 }
 0x1a9   :  { %328 = vpow2.f32 %v180_v18  ;;  %v178_v20 = vmul.f32 1.442695, %v176_v19 }
 0x1ab   :  { %330 = vpow2.f32 %v178_v20 }
 0x1af   :  { %v329_v21 = vpop.eup %328 }
 0x1b0   :  { %v183_v22 = vadd.f32 1.0, %v329_v21 }
 0x1b1   :  { %v331_v23 = vpop.eup %330 }
 0x1b2   :  { %332 = vrcp.f32 %v183_v22  ;;  %v182_v24 = vadd.f32 1.0, %v331_v23  ;;  %v210_v30 = vand.u32 2147483648, %v183_v22  ;;  %v208_v32 = vand.u32 2147483647, %v183_v22 }
 0x1b3   :  { %vm204_vm8 = vweird.f32 %v183_v22 }
 0x1b4   :  { %334 = vrcp.f32 %v182_v24  ;;  %v195_v34 = vand.u32 2147483648, %v182_v24  ;;  %v193_v37 = vand.u32 2147483647, %v182_v24  ;;  %v211_v38 = vor.u32 1.1754944e-38, %v210_v30 }
 0x1b5   :  { %vm209_vm11 = vcmp.eq.f32.partialorder %v208_v32, 8.507059e+37  ;;  %vm189_vm12 = vweird.f32 %v182_v24 }
 0x1b6   :  { %v196_v42 = vor.u32 1.1754944e-38, %v195_v34  ;;  %vm194_vm14 = vcmp.eq.f32.partialorder %v193_v37, 8.507059e+37 }
 0x1b8   :  { %v333_v25 = vpop.eup %332 }
 0x1b9   :  { %v200_v26 = vmul.f32 %v333_v25, %v183_v22  ;;  %vm205_vm7 = vweird.f32 %v333_v25 }
 0x1ba   :  { %v335_v27 = vpop.eup %334  ;;  %vm206_vm10 = vmor %vm204_vm8, %vm205_vm7 }
 0x1bb   :  { %v201_v28 = vsub.f32 1.0, %v200_v26  ;;  %v185_v29 = vmul.f32 %v335_v27, %v182_v24  ;;  %vm190_vm9 = vweird.f32 %v335_v27 }
 0x1bc   :  { %vm191_vm13 = vmor %vm189_vm12, %vm190_vm9 }
 0x1bd   :  { %v202_v31 = vmul.f32 %v333_v25, %v201_v28  ;;  %v186_v33 = vsub.f32 1.0, %v185_v29 }
 0x1bf   :  { %v203_v35 = vadd.f32 %v333_v25, %v202_v31  ;;  %v187_v36 = vmul.f32 %v335_v27, %v186_v33 }
 0x1c1   :  { %v207_v39 = vsel %vm206_vm10, %v333_v25, %v203_v35  ;;  %v188_v40 = vadd.f32 %v335_v27, %v187_v36 }
 0x1c2   :  { %v212_v41 = vsel %vm209_vm11, %v211_v38, %v207_v39 }
 0x1c3   :  { %v215_v43 = vmul.f32 %v212_v41, %v174_v14  ;;  %v192_v44 = vsel %vm191_vm13, %v335_v27, %v188_v40 }
 0x1c4   :  { %v197_v45 = vsel %vm194_vm14, %v196_v42, %v192_v44 }
 0x1c5   :  { %252 = vmatmul.f32.vlgmr.msra.gmra.mxu3 %v215_v43  ;;  %v214_v46 = vmul.f32 %v197_v45, %v171_v17 }
 0x1c7   :  { %249 = vmatmul.f32.vlgmr.msra.gmra.mxu1 %v214_v46 }
 0x244   :  { %v250_v48 = vpop.f32.mrf.mxu1 }
 0x245   :  { %v251_v49 = vadd.f32 %v323_v47, %v250_v48 }
 0x247   :  { %v256_v50 = vadd.f32 %v251_v49, %v520_v1 }
 0x248   :  { %v253_v51 = vpop.f32.mrf.mxu3 }
 0x249   :  { %258 = vst [vmem:[#allocation10] sm:$0xff] %v256_v50  ;;  %v254_v52 = vadd.f32 %v323_v47, %v253_v51 }
 0x24b   :  { %v257_v53 = vadd.f32 %v254_v52, %v517_v0 }
 0x24d   :  { %259 = vst [vmem:[#allocation10 + $0x8] sm:$0xff] %v257_v53 }
 0x24e   :  { %272 = dma.vmem_to_hbm [thread:$0]  %s265_s3, 256, %s267_s11, [#allocation4], %s466_s25, %s466_s25, %s467_s26  }
 0x24f   :  { %462 = dma.done.wait [#allocation4], 256  }
 0x250   :  { %463 = vsyncadd [#allocation4], 4294967040 }
 0x251   :  { %277 = vsyncpa [#allocation3], 1 }
 0x252   :  { %278 = vsyncpa [#allocation6], 1 }
 0x253   :  { %279 = vsyncpa [#allocation9], 1 }
 0x254   :  { %280 = vsyncpa [#allocation4], 1 }

// kernel: tpu_custom_call.1
= control target key start
LH: loop header
LB: loop body
LE: loop exit
PB: predicated region body
PF: predicated region fallthrough
CT: control target
= control target key end

     0   :  { %9 = vsyncpa [#allocation3], 0  ;;  %s543_s0 = inlined_call_operand.hbm [shape: f32[16,128], index: 0, kind: input, shape index: {}]   ;;  %s544_s1 = inlined_call_operand.hbm [shape: f32[4,128], index: 1, kind: input, shape index: {}]   ;;  %s545_s2 = inlined_call_operand.hbm [shape: f32[128,128], index: 2, kind: input, shape index: {}]   ;;  %s546_s3 = inlined_call_operand.hbm [shape: f32[128,128], index: 3, kind: input, shape index: {}]   ;;  %s547_s4 = inlined_call_operand.hbm [shape: f32[16,128], index: 4, kind: output, shape index: {}]  }
   0x1   :  { %10 = vsyncpa [#allocation6], 0 }
   0x2   :  { %11 = vsyncpa [#allocation9], 0  ;;  %s31_s17 = sshll.u32 %s544_s1, 4  ;;  %s32_s17 = int_to_ptr.hbm [resolvable:$true] %s31_s17 }
   0x3   :  { %12 = vsyncpa [#allocation4], 0  ;;  %s464_s18 = smov [#allocation5]   ;;  %s17_s22 = sshll.u32 %s543_s0, 4  ;;  %s18_s22 = int_to_ptr.hbm [resolvable:$true] %s17_s22 }
   0x4   :  { %s33_s19 = sshll.u32 %s464_s18, 4  ;;  %s465_s23 = smov [#allocation2]   ;;  %s34_s19 = int_to_ptr.vmem [resolvable:$true] %s33_s19 }
   0x5   :  { %36 = dma.hbm_to_vmem [thread:$0]  %s32_s17, 64, %s34_s19, [#allocation6]  }
   0x6   :  { %s19_s24 = sshll.u32 %s465_s23, 4  ;;  %s466_s25 = smov 128   ;;  %s20_s24 = int_to_ptr.vmem [resolvable:$true] %s19_s24 }
   0x7   :  { %s467_s26 = smov 8   ;;  %s41_s28 = sshll.u32 %s545_s2, 4  ;;  %s42_s28 = int_to_ptr.hbm [resolvable:$true] %s41_s28 }
   0x8   :  { %25 = dma.hbm_to_vmem [thread:$0]  %s18_s22, 256, %s20_s24, [#allocation3], %s466_s25, %s466_s25, %s467_s26  }
   0x9   :  { %s468_s29 = smov [#allocation7]   ;;  %s54_s6 = sshll.u32 %s546_s3, 4  ;;  %s55_s6 = int_to_ptr.hbm [resolvable:$true] %s54_s6 }
   0xa   :  { %s43_s30 = sshll.u32 %s468_s29, 4  ;;  %s469_s7 = smov [#allocation8]   ;;  %s44_s30 = int_to_ptr.vmem [resolvable:$true] %s43_s30 }
   0xb   :  { %49 = dma.hbm_to_vmem [thread:$0]  %s42_s28, 2048, %s44_s30, [#allocation6], %s466_s25, %s466_s25, %s467_s26  }
   0xc   :  { %s56_s8 = sshll.u32 %s469_s7, 4  ;;  %s57_s8 = int_to_ptr.vmem [resolvable:$true] %s56_s8 }
   0xd   :  { %62 = dma.hbm_to_vmem [thread:$0]  %s55_s6, 2048, %s57_s8, [#allocation9], %s466_s25, %s466_s25, %s467_s26  }
   0xe   :  { %456 = dma.done.wait [#allocation3], 256  }
   0xf   :  { %457 = vsyncadd [#allocation3], 4294967040 }
  0x10   :  { %458 = dma.done.wait [#allocation6], 2112  }
  0x11   :  { %459 = vsyncadd [#allocation6], 4294965184 }
  0x12   :  { %460 = dma.done.wait [#allocation9], 2048  }
  0x13   :  { %461 = vsyncadd [#allocation9], 4294965248  ;;  %v517_v0 = vld [vmem:[#allocation2 + $0x8] sm:$0xff]  ;;  %v520_v1 = vld [vmem:[#allocation2] sm:$0xff]  ;;  %v93_v4 = vlaneseq  ;;  %s470_s2 = smov [#allocation10]   ;;  %s266_s11 = sshll.u32 %s547_s4, 4  ;;  %s267_s11 = int_to_ptr.hbm [resolvable:$true] %s266_s11 }
  0x14   :  { %87 = vadd.xlane.f32.xlu0 %v517_v0  ;;  %v151_v2 = vld [vmem:[#allocation7 + $0x78] sm:$0xff]  ;;  %v150_v3 = vld [vmem:[#allocation7 + $0x70] sm:$0xff]  ;;  %v149_v16 = vld [vmem:[#allocation7 + $0x68] sm:$0xff]  ;;  %s264_s3 = sshll.u32 %s470_s2, 4  ;;  %s265_s3 = int_to_ptr.vmem [resolvable:$true] %s264_s3 }
  0x15   :  { %281 = vmatpush.msra.mxu2 %v151_v2  ;;  %153 = vmatpush.msra.mxu0 %v151_v2  ;;  %v94_v5 = vand.u32 127, %v93_v4  ;;  %v148_v17 = vld [vmem:[#allocation7 + $0x60] sm:$0xff]  ;;  %v147_v18 = vld [vmem:[#allocation7 + $0x58] sm:$0xff]  ;;  %v146_v19 = vld [vmem:[#allocation7 + $0x50] sm:$0xff] }
  0x16   :  { %v145_v20 = vld [vmem:[#allocation7 + $0x48] sm:$0xff]  ;;  %v144_v21 = vld [vmem:[#allocation7 + $0x40] sm:$0xff]  ;;  %v143_v22 = vld [vmem:[#allocation7 + $0x38] sm:$0xff] }
  0x17   :  { %282 = vmatpush.msra.mxu2 %v150_v3  ;;  %154 = vmatpush.msra.mxu0 %v150_v3  ;;  %vm95_vm0 = vcmp.lt.s32.totalorder %v94_v5, 32  ;;  %v142_v23 = vld [vmem:[#allocation7 + $0x30] sm:$0xff]  ;;  %v141_v24 = vld [vmem:[#allocation7 + $0x28] sm:$0xff]  ;;  %v140_v25 = vld [vmem:[#allocation7 + $0x20] sm:$0xff] }
  0x18   :  { %v139_v26 = vld [vmem:[#allocation7 + $0x18] sm:$0xff]  ;;  %v138_v27 = vld [vmem:[#allocation7 + $0x10] sm:$0xff]  ;;  %v137_v28 = vld [vmem:[#allocation7 + $0x8] sm:$0xff] }
  0x19   :  { %283 = vmatpush.msra.mxu2 %v149_v16  ;;  %155 = vmatpush.msra.mxu0 %v149_v16  ;;  %v136_v29 = vld [vmem:[#allocation7] sm:$0xff]  ;;  %v320_v44 = vld [vmem:[#allocation5] ss:$0 sm:$0xff]  ;;  %v321_v48 = vld [vmem:[#allocation5 + $0x1] ss:$0 sm:$0xff] }
  0x1a   :  { %v231_v58 = vld [vmem:[#allocation8 + $0x78] sm:$0xff]  ;;  %v230_v59 = vld [vmem:[#allocation8 + $0x70] sm:$0xff]  ;;  %v229_v60 = vld [vmem:[#allocation8 + $0x68] sm:$0xff] }
  0x1b   :  { %284 = vmatpush.msra.mxu2 %v148_v17  ;;  %156 = vmatpush.msra.mxu0 %v148_v17  ;;  %v228_v61 = vld [vmem:[#allocation8 + $0x60] sm:$0xff]  ;;  %v227_v62 = vld [vmem:[#allocation8 + $0x58] sm:$0xff]  ;;  %v226_v63 = vld [vmem:[#allocation8 + $0x50] sm:$0xff] }
  0x1c   :  { %85 = vadd.xlane.f32.xlu0 %v520_v1  ;;  %297 = vmatpush.msra.mxu3 %v231_v58  ;;  %v225_v2 = vld [vmem:[#allocation8 + $0x48] sm:$0xff]  ;;  %v224_v3 = vld [vmem:[#allocation8 + $0x40] sm:$0xff]  ;;  %v223_v4 = vld [vmem:[#allocation8 + $0x38] sm:$0xff] }
  0x1d   :  { %285 = vmatpush.msra.mxu2 %v147_v18  ;;  %157 = vmatpush.msra.mxu0 %v147_v18  ;;  %v222_v5 = vld [vmem:[#allocation8 + $0x30] sm:$0xff] }
  0x1e   :  { %233 = vmatpush.msra.mxu1 %v231_v58  ;;  %298 = vmatpush.msra.mxu3 %v230_v59 }
  0x1f   :  { %286 = vmatpush.msra.mxu2 %v146_v19  ;;  %158 = vmatpush.msra.mxu0 %v146_v19 }
  0x20   :  { %234 = vmatpush.msra.mxu1 %v230_v59  ;;  %299 = vmatpush.msra.mxu3 %v229_v60 }
  0x21   :  { %287 = vmatpush.msra.mxu2 %v145_v20  ;;  %159 = vmatpush.msra.mxu0 %v145_v20 }
  0x22   :  { %235 = vmatpush.msra.mxu1 %v229_v60  ;;  %300 = vmatpush.msra.mxu3 %v228_v61 }
  0x23   :  { %288 = vmatpush.msra.mxu2 %v144_v21  ;;  %160 = vmatpush.msra.mxu0 %v144_v21 }
  0x24   :  { %236 = vmatpush.msra.mxu1 %v228_v61  ;;  %301 = vmatpush.msra.mxu3 %v227_v62 }
  0x25   :  { %289 = vmatpush.msra.mxu2 %v143_v22  ;;  %161 = vmatpush.msra.mxu0 %v143_v22 }
  0x26   :  { %237 = vmatpush.msra.mxu1 %v227_v62  ;;  %302 = vmatpush.msra.mxu3 %v226_v63 }
  0x27   :  { %290 = vmatpush.msra.mxu2 %v142_v23  ;;  %162 = vmatpush.msra.mxu0 %v142_v23 }
  0x28   :  { %238 = vmatpush.msra.mxu1 %v226_v63  ;;  %303 = vmatpush.msra.mxu3 %v225_v2 }
  0x29   :  { %291 = vmatpush.msra.mxu2 %v141_v24  ;;  %163 = vmatpush.msra.mxu0 %v141_v24 }
  0x2a   :  { %239 = vmatpush.msra.mxu1 %v225_v2  ;;  %304 = vmatpush.msra.mxu3 %v224_v3 }
  0x2b   :  { %292 = vmatpush.msra.mxu2 %v140_v25  ;;  %164 = vmatpush.msra.mxu0 %v140_v25 }
  0x2c   :  { %240 = vmatpush.msra.mxu1 %v224_v3  ;;  %305 = vmatpush.msra.mxu3 %v223_v4 }
  0x2d   :  { %293 = vmatpush.msra.mxu2 %v139_v26  ;;  %165 = vmatpush.msra.mxu0 %v139_v26 }
  0x2e   :  { %241 = vmatpush.msra.mxu1 %v223_v4  ;;  %306 = vmatpush.msra.mxu3 %v222_v5 }
  0x2f   :  { %294 = vmatpush.msra.mxu2 %v138_v27  ;;  %166 = vmatpush.msra.mxu0 %v138_v27 }
  0x30   :  { %242 = vmatpush.msra.mxu1 %v222_v5 }
  0x31   :  { %295 = vmatpush.msra.mxu2 %v137_v28  ;;  %167 = vmatpush.msra.mxu0 %v137_v28 }
  0x33   :  { %296 = vmatpush.msra.mxu2 %v136_v29  ;;  %168 = vmatpush.msra.mxu0 %v136_v29 }
  0x87   :  { %v88_v6 = vpop.xlane.xlu0 %87 }
  0x88   :  { %v90_v7 = vmul.f32 0.03125, %v88_v6  ;;  %v221_v6 = vld [vmem:[#allocation8 + $0x28] sm:$0xff] }
  0x89   :  { %307 = vmatpush.msra.mxu3 %v221_v6  ;;  %243 = vmatpush.msra.mxu1 %v221_v6 }
  0x8a   :  { %v92_v8 = vsub.f32 %v517_v0, %v90_v7  ;;  %v220_v7 = vld [vmem:[#allocation8 + $0x20] sm:$0xff] }
  0x8b   :  { %308 = vmatpush.msra.mxu3 %v220_v7  ;;  %244 = vmatpush.msra.mxu1 %v220_v7 }
  0x8c   :  { %v524_v9 = vsel %vm95_vm0, %v92_v8, 0.0  ;;  %v219_v8 = vld [vmem:[#allocation8 + $0x18] sm:$0xff] }
  0x8d   :  { %v99_v10 = vmul.f32 %v524_v9, %v524_v9  ;;  %309 = vmatpush.msra.mxu3 %v219_v8  ;;  %245 = vmatpush.msra.mxu1 %v219_v8 }
  0x8f   :  { %102 = vadd.xlane.f32.xlu1 %v99_v10  ;;  %v86_v11 = vpop.xlane.xlu0 %85  ;;  %v322_v10 = vld [vmem:[#allocation5 + $0x2] ss:$0 sm:$0xff] }
  0x90   :  { %v89_v12 = vmul.f32 0.03125, %v86_v11  ;;  %v217_v11 = vld [vmem:[#allocation8 + $0x8] sm:$0xff] }
  0x92   :  { %v91_v13 = vsub.f32 %v520_v1, %v89_v12  ;;  %v216_v12 = vld [vmem:[#allocation8] sm:$0xff] }
  0x94   :  { %v529_v14 = vsel %vm95_vm0, %v91_v13, 0.0 }
  0x95   :  { %v98_v15 = vmul.f32 %v529_v14, %v529_v14 }
  0x97   :  { %100 = vadd.xlane.f32.xlu1 %v98_v15 }
 0x102   :  { %v103_v30 = vpop.xlane.xlu1 %102 }
 0x103   :  { %v105_v31 = vmul.f32 0.03125, %v103_v30 }
 0x105   :  { %v107_v32 = vadd.f32 1e-06, %v105_v31 }
 0x107   :  { %324 = vrsqrt.f32 %v107_v32  ;;  %vm124_vm2 = vweird.f32 %v107_v32 }
 0x10a   :  { %v101_v33 = vpop.xlane.xlu1 %100 }
 0x10b   :  { %v104_v34 = vmul.f32 0.03125, %v101_v33 }
 0x10d   :  { %v325_v35 = vpop.eup %324  ;;  %v106_v36 = vadd.f32 1e-06, %v104_v34 }
 0x10e   :  { %v119_v37 = vmul.f32 %v325_v35, %v107_v32  ;;  %vm125_vm1 = vweird.f32 %v325_v35 }
 0x10f   :  { %326 = vrsqrt.f32 %v106_v36  ;;  %vm126_vm3 = vmor %vm124_vm2, %vm125_vm1  ;;  %vm114_vm5 = vweird.f32 %v106_v36 }
 0x110   :  { %v120_v38 = vmul.f32 %v325_v35, %v119_v37 }
 0x112   :  { %v121_v39 = vmul.f32 0.5, %v120_v38 }
 0x114   :  { %v122_v40 = vsub.f32 1.5, %v121_v39 }
 0x115   :  { %v327_v41 = vpop.eup %326 }
 0x116   :  { %v123_v42 = vmul.f32 %v325_v35, %v122_v40  ;;  %v109_v43 = vmul.f32 %v327_v41, %v106_v36  ;;  %vm115_vm4 = vweird.f32 %v327_v41 }
 0x117   :  { %vm116_vm6 = vmor %vm114_vm5, %vm115_vm4 }
 0x118   :  { %v110_v45 = vmul.f32 %v327_v41, %v109_v43  ;;  %v127_v46 = vsel %vm126_vm3, %v325_v35, %v123_v42 }
 0x119   :  { %v129_v47 = vmul.f32 %v127_v46, %v524_v9  ;;  %v218_v9 = vld [vmem:[#allocation8 + $0x10] sm:$0xff] }
 0x11a   :  { %v111_v49 = vmul.f32 0.5, %v110_v45  ;;  %310 = vmatpush.msra.mxu3 %v218_v9  ;;  %246 = vmatpush.msra.mxu1 %v218_v9 }
 0x11b   :  { %v132_v50 = vmul.f32 %v320_v44, %v129_v47  ;;  %v323_v47 = vld [vmem:[#allocation5 + $0x3] ss:$0 sm:$0xff] }
 0x11c   :  { %v112_v51 = vsub.f32 1.5, %v111_v49  ;;  %311 = vmatpush.msra.mxu3 %v217_v11  ;;  %247 = vmatpush.msra.mxu1 %v217_v11 }
 0x11d   :  { %v135_v52 = vadd.f32 %v321_v48, %v132_v50 }
 0x11e   :  { %v113_v53 = vmul.f32 %v327_v41, %v112_v51  ;;  %312 = vmatpush.msra.mxu3 %v216_v12  ;;  %248 = vmatpush.msra.mxu1 %v216_v12 }
 0x11f   :  { %172 = vmatmul.f32.vlgmr.msra.gmra.mxu2 %v135_v52 }
 0x120   :  { %v117_v54 = vsel %vm116_vm6, %v327_v41, %v113_v53 }
 0x121   :  { %v128_v55 = vmul.f32 %v117_v54, %v529_v14 }
 0x123   :  { %v131_v56 = vmul.f32 %v320_v44, %v128_v55 }
 0x125   :  { %v134_v57 = vadd.f32 %v321_v48, %v131_v56 }
 0x127   :  { %169 = vmatmul.f32.vlgmr.msra.gmra.mxu0 %v134_v57 }
 0x1a2   :  { %v173_v13 = vpop.f32.mrf.mxu2 }
 0x1a3   :  { %v174_v14 = vadd.f32 %v322_v10, %v173_v13 }
 0x1a4   :  { %v170_v15 = vpop.f32.mrf.mxu0 }
 0x1a5   :  { %v177_v16 = vsub.f32 0.0, %v174_v14  ;;  %v171_v17 = vadd.f32 %v322_v10, %v170_v15 }
 0x1a7   :  { %v180_v18 = vmul.f32 1.442695, %v177_v16  ;;  %v176_v19 = vsub.f32 0.0, %v171_v17 }
 0x1a9   :  { %328 = vpow2.f32 %v180_v18  ;;  %v178_v20 = vmul.f32 1.442695, %v176_v19 }
 0x1ab   :  { %330 = vpow2.f32 %v178_v20 }
 0x1af   :  { %v329_v21 = vpop.eup %328 }
 0x1b0   :  { %v183_v22 = vadd.f32 1.0, %v329_v21 }
 0x1b1   :  { %v331_v23 = vpop.eup %330 }
 0x1b2   :  { %332 = vrcp.f32 %v183_v22  ;;  %v182_v24 = vadd.f32 1.0, %v331_v23  ;;  %v210_v30 = vand.u32 2147483648, %v183_v22  ;;  %v208_v32 = vand.u32 2147483647, %v183_v22 }
 0x1b3   :  { %vm204_vm8 = vweird.f32 %v183_v22 }
 0x1b4   :  { %334 = vrcp.f32 %v182_v24  ;;  %v195_v34 = vand.u32 2147483648, %v182_v24  ;;  %v193_v37 = vand.u32 2147483647, %v182_v24  ;;  %v211_v38 = vor.u32 1.1754944e-38, %v210_v30 }
 0x1b5   :  { %vm209_vm11 = vcmp.eq.f32.partialorder %v208_v32, 8.507059e+37  ;;  %vm189_vm12 = vweird.f32 %v182_v24 }
 0x1b6   :  { %v196_v42 = vor.u32 1.1754944e-38, %v195_v34  ;;  %vm194_vm14 = vcmp.eq.f32.partialorder %v193_v37, 8.507059e+37 }
 0x1b8   :  { %v333_v25 = vpop.eup %332 }
 0x1b9   :  { %v200_v26 = vmul.f32 %v333_v25, %v183_v22  ;;  %vm205_vm7 = vweird.f32 %v333_v25 }
 0x1ba   :  { %v335_v27 = vpop.eup %334  ;;  %vm206_vm10 = vmor %vm204_vm8, %vm205_vm7 }
 0x1bb   :  { %v201_v28 = vsub.f32 1.0, %v200_v26  ;;  %v185_v29 = vmul.f32 %v335_v27, %v182_v24  ;;  %vm190_vm9 = vweird.f32 %v335_v27 }
 0x1bc   :  { %vm191_vm13 = vmor %vm189_vm12, %vm190_vm9 }
 0x1bd   :  { %v202_v31 = vmul.f32 %v333_v25, %v201_v28  ;;  %v186_v33 = vsub.f32 1.0, %v185_v29 }
 0x1bf   :  { %v203_v35 = vadd.f32 %v333_v25, %v202_v31  ;;  %v187_v36 = vmul.f32 %v335_v27, %v186_v33 }
 0x1c1   :  { %v207_v39 = vsel %vm206_vm10, %v333_v25, %v203_v35  ;;  %v188_v40 = vadd.f32 %v335_v27, %v187_v36 }
 0x1c2   :  { %v212_v41 = vsel %vm209_vm11, %v211_v38, %v207_v39 }
 0x1c3   :  { %v215_v43 = vmul.f32 %v212_v41, %v174_v14  ;;  %v192_v44 = vsel %vm191_vm13, %v335_v27, %v188_v40 }
 0x1c4   :  { %v197_v45 = vsel %vm194_vm14, %v196_v42, %v192_v44 }
 0x1c5   :  { %252 = vmatmul.f32.vlgmr.msra.gmra.mxu3 %v215_v43  ;;  %v214_v46 = vmul.f32 %v197_v45, %v171_v17 }
 0x1c7   :  { %249 = vmatmul.f32.vlgmr.msra.gmra.mxu1 %v214_v46 }
 0x244   :  { %v250_v48 = vpop.f32.mrf.mxu1 }
 0x245   :  { %v251_v49 = vadd.f32 %v323_v47, %v250_v48 }
 0x247   :  { %v256_v50 = vadd.f32 %v251_v49, %v520_v1 }
 0x248   :  { %v253_v51 = vpop.f32.mrf.mxu3 }
 0x249   :  { %258 = vst [vmem:[#allocation10] sm:$0xff] %v256_v50  ;;  %v254_v52 = vadd.f32 %v323_v47, %v253_v51 }
 0x24b   :  { %v257_v53 = vadd.f32 %v254_v52, %v517_v0 }
 0x24d   :  { %259 = vst [vmem:[#allocation10 + $0x8] sm:$0xff] %v257_v53 }
 0x24e   :  { %272 = dma.vmem_to_hbm [thread:$0]  %s265_s3, 256, %s267_s11, [#allocation4], %s466_s25, %s466_s25, %s467_s26  }
 0x24f   :  { %462 = dma.done.wait [#allocation4], 256  }
 0x250   :  { %463 = vsyncadd [#allocation4], 4294967040 }
 0x251   :  { %277 = vsyncpa [#allocation3], 1 }
 0x252   :  { %278 = vsyncpa [#allocation6], 1 }
 0x253   :  { %279 = vsyncpa [#allocation9], 1 }
 0x254   :  { %280 = vsyncpa [#allocation4], 1 }

</bundles_post_ra>
